<compile_context>
chip_gen: v5e
topology: v5e:2x2
jax: 0.10.0
libtpu: 0.0.40
codegen_flags: <defaults>
</compile_context>

<pallas_src>
import functools

import jax
import jax.numpy as jnp
from jax.experimental import pallas as pl
from jax.experimental.pallas import tpu as pltpu

LANE = 128


def _round_up(x, m):
    return (x + m - 1) // m * m


def _layer(x, sel_oh, dst_oh, inv_cnt, wm_ref, bm_ref, wk_ref, bk_ref,
           g_ref, be_ref, f_real, eps):
    """One fused GCN layer: messages + scatter + mean/ReLU + skip + LayerNorm.

    x       : (N, Fin)     f32 node features
    sel_oh  : (E, 3N)      bf16 one-hot of (src + bucket*N)   (gather + select)
    dst_oh  : (N, E)       bf16 one-hot of dst (pre-transposed orientation)
    inv_cnt : (N, 1)       f32 1 / max(neighbor_count, 1)
    wm_ref  : (3, Fin, Fp) stacked [W_orig, W_inv, W_self] (pre-transposed, padded)
    bm_ref  : (3, 1, Fp)   stacked biases
    wk_ref  : (Fin, Fp)    skip weight; bk/g/be : (1, Fp)
    f_real  : real (unpadded) feature count used by the LayerNorm statistics
    """
    # Node-level per-bucket transforms: 3 x (N,Fin)@(Fin,Fp) on the MXU (f32).
    y = [jnp.dot(x, wm_ref[k], preferred_element_type=jnp.float32) + bm_ref[k]
         for k in range(3)]
    ystack = jnp.concatenate(y, axis=0).astype(jnp.bfloat16)           # (3N, Fp)

    # Gather + bucket-select in one bf16 MXU pass:
    #   msg[e] = ystack[src_e + bucket_e * N] = x[src_e] @ W_bucket + b_bucket
    msg = jnp.dot(sel_oh, ystack, preferred_element_type=jnp.float32)  # (E, Fp)

    # Scatter-add to destination nodes (contracting the LAST dim of dst_oh).
    # msg values are already exactly bf16-representable, so this cast is exact.
    agg = jnp.dot(dst_oh, msg.astype(jnp.bfloat16),
                  preferred_element_type=jnp.float32)                  # (N, Fp)

    # Mean-normalize (EUP reciprocal) + ReLU, then skip connection.
    h = jnp.maximum(agg * inv_cnt, 0.0)
    h = h + jnp.dot(x, wk_ref[...], preferred_element_type=jnp.float32) + bk_ref[...]

    # LayerNorm over the REAL feature width; padded lanes of h are exactly 0,
    # so one pass computes sum and sum-of-squares over all 128 lanes.
    inv_f = 1.0 / f_real
    mean = jnp.sum(h, axis=-1, keepdims=True) * inv_f
    msq = jnp.sum(h * h, axis=-1, keepdims=True) * inv_f
    var = msq - mean * mean
    hn = (h - mean) * jax.lax.rsqrt(var + eps)
    return hn * g_ref[...] + be_ref[...]     # padded gamma/beta are 0 -> padded lanes stay 0


def gcn_fused_kernel(sel_ref, dst_ref, x_ref,
                     wm1_ref, bm1_ref, wk1_ref, bk1_ref, g1_ref, be1_ref,
                     wm2_ref, bm2_ref, wk2_ref, bk2_ref, g2_ref, be2_ref,
                     out_ref, *, hid_real, out_real, eps=1e-5):
    """Fused 2-layer relational GCN forward (inference)."""
    x = x_ref[...]                                        # (N, Fin) f32
    N = x.shape[0]
    E = sel_ref.shape[0]

    sel = sel_ref[...]                                    # (E, 1) int32 in [0, 3N)
    dst = dst_ref[...]                                    # (1, E) int32 in [0, N)

    # bf16 one-hots (0/1 exact). sel_oh fuses the src gather with bucket select.
    sel_oh = (jax.lax.broadcasted_iota(jnp.int32, (E, 3 * N), 1) == sel
              ).astype(jnp.bfloat16)                      # (E, 3N)
    dst_oh = (jax.lax.broadcasted_iota(jnp.int32, (N, E), 0) == dst
              ).astype(jnp.bfloat16)                      # (N, E)

    # Neighbor counts: shared by both layers; cheap lane reduce (no MXU pass).
    counts = jnp.sum(dst_oh.astype(jnp.float32), axis=-1, keepdims=True)   # (N, 1)
    inv_cnt = pl.reciprocal(jnp.maximum(counts, 1.0), approx=True)

    x1 = _layer(x, sel_oh, dst_oh, inv_cnt, wm1_ref, bm1_ref, wk1_ref, bk1_ref,
                g1_ref, be1_ref, hid_real, eps)
    x2 = _layer(x1, sel_oh, dst_oh, inv_cnt, wm2_ref, bm2_ref, wk2_ref, bk2_ref,
                g2_ref, be2_ref, out_real, eps)
    out_ref[...] = x2


# ---------------------------------------------------------------------------
# Host-side packing / wrapper
# ---------------------------------------------------------------------------

def _pad_axis(a, axis, target):
    pad = target - a.shape[axis]
    if pad <= 0:
        return a
    widths = [(0, 0)] * a.ndim
    widths[axis] = (0, pad)
    return jnp.pad(a, widths)


def _pack_layer(p, fin_pad, fout_pad):
    """Zero-pad one layer's params to lane-dense widths and stack the 3 bucket linears."""
    def pw(w):   # (Fin, Fout) -> (fin_pad, fout_pad)
        return _pad_axis(_pad_axis(w, 0, fin_pad), 1, fout_pad)

    def pb(b):   # (1, Fout) -> (1, fout_pad)
        return _pad_axis(b, 1, fout_pad)

    wm = jnp.stack([pw(p["wo"]), pw(p["wi"]), pw(p["ws"])], axis=0)    # (3, fin_pad, fout_pad)
    bm = jnp.stack([pb(p["bo"]), pb(p["bi"]), pb(p["bs"])], axis=0)    # (3, 1, fout_pad)
    return dict(wm=wm, bm=bm, wk=pw(p["wk"]), bk=pb(p["bk"]),
                gamma=pb(p["gamma"]), beta=pb(p["beta"]))


def gcn_forward(edges, node_emb, params1, params2, num_relations):
    """Full GCN.forward(edges) (inference: dropout = identity)."""
    N, in_f = node_emb.shape
    hid_f = params1["wo"].shape[1]
    out_f = params2["wo"].shape[1]
    E = edges.shape[0]
    hid_p = _round_up(hid_f, LANE)
    out_p = _round_up(out_f, LANE)

    src = edges[:, 0].astype(jnp.int32)
    typ = edges[:, 1].astype(jnp.int32)
    dst = edges[:, 2].astype(jnp.int32)

    # Relation bucket: 0 = original, 1 = inverse, 2 = self-loop (typ >= 2*R).
    bucket = jnp.where(typ < num_relations, 0,
                       jnp.where(typ < 2 * num_relations, 1, 2)).astype(jnp.int32)
    sel_idx = (src + bucket * N).reshape(E, 1)     # (E, 1) gather+select index
    dst_row = dst.reshape(1, E)                    # (1, E) scatter index

    l1 = _pack_layer(params1, in_f, hid_p)         # layer 1: (in_f, hid_p)
    l2 = _pack_layer(params2, hid_p, out_p)        # layer 2: (hid_p, out_p)

    kernel = functools.partial(gcn_fused_kernel, hid_real=hid_f, out_real=out_f)
    vmem = pl.BlockSpec(memory_space=pltpu.MemorySpace.VMEM)

    out_padded = pl.pallas_call(
        kernel,
        out_shape=jax.ShapeDtypeStruct((N, out_p), jnp.float32),
        in_specs=[vmem] * 15,
        out_specs=vmem,
        compiler_params=pltpu.CompilerParams(
            # Footprint here is < 1 MiB; raise the scoped limit explicitly so the
            # 16/32 MiB defaults never bind, while staying well inside v7x's
            # 64 MiB physical VMEM.
            vmem_limit_bytes=32 * 1024 * 1024),
    )(sel_idx, dst_row, node_emb,
      l1["wm"], l1["bm"], l1["wk"], l1["bk"], l1["gamma"], l1["beta"],
      l2["wm"], l2["bm"], l2["wk"], l2["bk"], l2["gamma"], l2["beta"])

    return out_padded[:, :out_f]


# ---------------------------------------------------------------------------
# Parameter init (deterministic; weights stored transposed (Fin, Fout))
# ---------------------------------------------------------------------------

def init_linear(key, fin, fout):
    kw, kb = jax.random.split(key)
    bound = 1.0 / jnp.sqrt(fin)
    w = jax.random.uniform(kw, (fin, fout), jnp.float32, -bound, bound)
    b = jax.random.uniform(kb, (1, fout), jnp.float32, -bound, bound)
    return w, b


def init_layer_params(key, fin, fout):
    ks = jax.random.split(key, 4)
    wo, bo = init_linear(ks[0], fin, fout)
    wi, bi = init_linear(ks[1], fin, fout)
    ws, bs = init_linear(ks[2], fin, fout)
    wk, bk = init_linear(ks[3], fin, fout)
    return dict(wo=wo, bo=bo, wi=wi, bi=bi, ws=ws, bs=bs, wk=wk, bk=bk,
                gamma=jnp.ones((1, fout), jnp.float32),
                beta=jnp.zeros((1, fout), jnp.float32))


# ---------------------------------------------------------------------------
# Plain-JAX reference (f32 everywhere) for a correctness check
# ---------------------------------------------------------------------------

def gcn_forward_ref(edges, node_emb, params1, params2, num_relations):
    def layer(x, p):
        src, typ, dst = edges[:, 0], edges[:, 1], edges[:, 2]
        sf = x[src]
        mo = (typ < num_relations)[:, None].astype(jnp.float32)
        mi = ((typ >= num_relations) & (typ < 2 * num_relations))[:, None].astype(jnp.float32)
        ms = (typ >= 2 * num_relations)[:, None].astype(jnp.float32)
        msg = (mo * (sf @ p["wo"] + p["bo"]) + mi * (sf @ p["wi"] + p["bi"])
               + ms * (sf @ p["ws"] + p["bs"]))
        N = x.shape[0]
        agg = jax.ops.segment_sum(msg, dst, num_segments=N)
        cnt = jnp.maximum(jax.ops.segment_sum(jnp.ones_like(dst, jnp.float32), dst,
                                              num_segments=N), 1.0)[:, None]
        h = jnp.maximum(agg / cnt, 0.0) + x @ p["wk"] + p["bk"]
        mean = jnp.mean(h, -1, keepdims=True)
        var = jnp.mean((h - mean) ** 2, -1, keepdims=True)
        return (h - mean) / jnp.sqrt(var + 1e-5) * p["gamma"] + p["beta"]
    return layer(layer(node_emb, params1), params2)


if __name__ == "__main__":
    key = jax.random.PRNGKey(0)
    num_nodes = 16
    num_relations = 4
    in_f, hid_f, out_f = 32, 32, 16
    E = 24

    k_emb, k_src, k_dst, k_typ, k_p1, k_p2 = jax.random.split(key, 6)

    # Node embedding table (xavier-uniform-like, deterministic).
    limit = jnp.sqrt(6.0 / (num_nodes + in_f))
    node_emb = jax.random.uniform(k_emb, (num_nodes, in_f), jnp.float32, -limit, limit)

    # Synthetic edge list: columns [src, relation_type, dst].
    src_ids = jax.random.randint(k_src, (E,), 0, num_nodes, jnp.int32)
    dst_ids = jax.random.randint(k_dst, (E,), 0, num_nodes, jnp.int32)
    etypes = jax.random.randint(k_typ, (E,), 0, 3 * num_relations, jnp.int32)
    edges = jnp.stack([src_ids, etypes, dst_ids], axis=1)   # (E, 3)

    params1 = init_layer_params(k_p1, in_f, hid_f)
    params2 = init_layer_params(k_p2, hid_f, out_f)

    out = gcn_forward(edges, node_emb, params1, params2, num_relations)
    out = jax.block_until_ready(out)

    ref = gcn_forward_ref(edges, node_emb, params1, params2, num_relations)
    assert out.shape == (num_nodes, out_f)
    # Tolerance is looser than the pure-f32 version because the gather/scatter
    # matmuls use bf16 operands (f32 accumulation) and counts use an approx
    # EUP reciprocal, per the performance review.
    assert jnp.allclose(out, ref, atol=3e-2, rtol=3e-2), "Pallas output mismatch vs JAX ref"

    print("KERNEL_OK")
</pallas_src>

<mosaic_0001>
module attributes {stable_mosaic.version = 11 : i64} {
  func.func @gcn_fused_kernel(%arg0: memref<24x1xi32, #tpu.memory_space<vmem>>, %arg1: memref<1x24xi32, #tpu.memory_space<vmem>>, %arg2: memref<16x32xf32, #tpu.memory_space<vmem>>, %arg3: memref<3x32x128xf32, #tpu.memory_space<vmem>>, %arg4: memref<3x1x128xf32, #tpu.memory_space<vmem>>, %arg5: memref<32x128xf32, #tpu.memory_space<vmem>>, %arg6: memref<1x128xf32, #tpu.memory_space<vmem>>, %arg7: memref<1x128xf32, #tpu.memory_space<vmem>>, %arg8: memref<1x128xf32, #tpu.memory_space<vmem>>, %arg9: memref<3x128x128xf32, #tpu.memory_space<vmem>>, %arg10: memref<3x1x128xf32, #tpu.memory_space<vmem>>, %arg11: memref<128x128xf32, #tpu.memory_space<vmem>>, %arg12: memref<1x128xf32, #tpu.memory_space<vmem>>, %arg13: memref<1x128xf32, #tpu.memory_space<vmem>>, %arg14: memref<1x128xf32, #tpu.memory_space<vmem>>, %arg15: memref<16x128xf32, #tpu.memory_space<vmem>>) attributes {dimension_semantics = [], scalar_prefetch = 0 : i64, scratch_operands = 0 : i64, tpu.core_type = #tpu.core_type<tc>} {
    %c0 = arith.constant 0 : index
    %c0_0 = arith.constant 0 : index
    %0 = vector.load %arg2[%c0, %c0_0] : memref<16x32xf32, #tpu.memory_space<vmem>>, vector<16x32xf32>
    %c0_1 = arith.constant 0 : index
    %c0_2 = arith.constant 0 : index
    %1 = vector.load %arg0[%c0_1, %c0_2] : memref<24x1xi32, #tpu.memory_space<vmem>>, vector<24x1xi32>
    %c0_3 = arith.constant 0 : index
    %c0_4 = arith.constant 0 : index
    %2 = vector.load %arg1[%c0_3, %c0_4] : memref<1x24xi32, #tpu.memory_space<vmem>>, vector<1x24xi32>
    %3 = tpu.iota {dimensions = array<i32: 1>} : vector<24x48xi32>
    %4 = vector.broadcast %1 : vector<24x1xi32> to vector<24x48xi32>
    %5 = arith.cmpi eq, %3, %4 : vector<24x48xi32>
    %6 = arith.extui %5 : vector<24x48xi1> to vector<24x48xi32>
    %7 = arith.sitofp %6 : vector<24x48xi32> to vector<24x48xf32>
    %8 = arith.truncf %7 : vector<24x48xf32> to vector<24x48xbf16>
    %9 = tpu.iota {dimensions = array<i32: 0>} : vector<16x24xi32>
    %10 = vector.broadcast %2 : vector<1x24xi32> to vector<16x24xi32>
    %11 = arith.cmpi eq, %9, %10 : vector<16x24xi32>
    %12 = arith.extui %11 : vector<16x24xi1> to vector<16x24xi32>
    %13 = arith.sitofp %12 : vector<16x24xi32> to vector<16x24xf32>
    %14 = arith.truncf %13 : vector<16x24xf32> to vector<16x24xbf16>
    %15 = arith.extf %14 : vector<16x24xbf16> to vector<16x24xf32>
    %cst = arith.constant dense<0.000000e+00> : vector<16xf32>
    %16 = vector.multi_reduction <add>, %15, %cst [1] : vector<16x24xf32> to vector<16xf32>
    %17 = vector.shape_cast %16 : vector<16xf32> to vector<16x1xf32>
    %cst_5 = arith.constant 1.000000e+00 : f32
    %18 = vector.broadcast %cst_5 : f32 to vector<16x1xf32>
    %19 = arith.maximumf %17, %18 : vector<16x1xf32>
    %20 = tpu.reciprocal %19 {approx = true} : vector<16x1xf32> -> vector<16x1xf32>
    %c0_6 = arith.constant 0 : index
    %c0_7 = arith.constant 0 : index
    %c0_8 = arith.constant 0 : index
    %21 = vector.load %arg3[%c0_6, %c0_7, %c0_8] : memref<3x32x128xf32, #tpu.memory_space<vmem>>, vector<1x32x128xf32>
    %22 = vector.shape_cast %21 : vector<1x32x128xf32> to vector<32x128xf32>
    %cst_9 = arith.constant dense<0.000000e+00> : vector<16x128xf32>
    %23 = tpu.matmul %0, %22, %cst_9 {dimension_numbers = #tpu.dot_dimension_numbers<[1], [0], [0], [1], [0, 0, 1, 1], [], []>} : vector<16x32xf32>, vector<32x128xf32>, vector<16x128xf32> -> vector<16x128xf32>
    %c0_10 = arith.constant 0 : index
    %c0_11 = arith.constant 0 : index
    %c0_12 = arith.constant 0 : index
    %24 = vector.load %arg4[%c0_10, %c0_11, %c0_12] : memref<3x1x128xf32, #tpu.memory_space<vmem>>, vector<1x1x128xf32>
    %25 = vector.shape_cast %24 : vector<1x1x128xf32> to vector<1x128xf32>
    %26 = vector.broadcast %25 : vector<1x128xf32> to vector<16x128xf32>
    %27 = arith.addf %23, %26 : vector<16x128xf32>
    %c1 = arith.constant 1 : index
    %c0_13 = arith.constant 0 : index
    %c0_14 = arith.constant 0 : index
    %28 = vector.load %arg3[%c1, %c0_13, %c0_14] : memref<3x32x128xf32, #tpu.memory_space<vmem>>, vector<1x32x128xf32>
    %29 = vector.shape_cast %28 : vector<1x32x128xf32> to vector<32x128xf32>
    %cst_15 = arith.constant dense<0.000000e+00> : vector<16x128xf32>
    %30 = tpu.matmul %0, %29, %cst_15 {dimension_numbers = #tpu.dot_dimension_numbers<[1], [0], [0], [1], [0, 0, 1, 1], [], []>} : vector<16x32xf32>, vector<32x128xf32>, vector<16x128xf32> -> vector<16x128xf32>
    %c1_16 = arith.constant 1 : index
    %c0_17 = arith.constant 0 : index
    %c0_18 = arith.constant 0 : index
    %31 = vector.load %arg4[%c1_16, %c0_17, %c0_18] : memref<3x1x128xf32, #tpu.memory_space<vmem>>, vector<1x1x128xf32>
    %32 = vector.shape_cast %31 : vector<1x1x128xf32> to vector<1x128xf32>
    %33 = vector.broadcast %32 : vector<1x128xf32> to vector<16x128xf32>
    %34 = arith.addf %30, %33 : vector<16x128xf32>
    %c2 = arith.constant 2 : index
    %c0_19 = arith.constant 0 : index
    %c0_20 = arith.constant 0 : index
    %35 = vector.load %arg3[%c2, %c0_19, %c0_20] : memref<3x32x128xf32, #tpu.memory_space<vmem>>, vector<1x32x128xf32>
    %36 = vector.shape_cast %35 : vector<1x32x128xf32> to vector<32x128xf32>
    %cst_21 = arith.constant dense<0.000000e+00> : vector<16x128xf32>
    %37 = tpu.matmul %0, %36, %cst_21 {dimension_numbers = #tpu.dot_dimension_numbers<[1], [0], [0], [1], [0, 0, 1, 1], [], []>} : vector<16x32xf32>, vector<32x128xf32>, vector<16x128xf32> -> vector<16x128xf32>
    %c2_22 = arith.constant 2 : index
    %c0_23 = arith.constant 0 : index
    %c0_24 = arith.constant 0 : index
    %38 = vector.load %arg4[%c2_22, %c0_23, %c0_24] : memref<3x1x128xf32, #tpu.memory_space<vmem>>, vector<1x1x128xf32>
    %39 = vector.shape_cast %38 : vector<1x1x128xf32> to vector<1x128xf32>
    %40 = vector.broadcast %39 : vector<1x128xf32> to vector<16x128xf32>
    %41 = arith.addf %37, %40 : vector<16x128xf32>
    %42 = tpu.concatenate %27, %34, %41 in 0 : vector<16x128xf32>, vector<16x128xf32>, vector<16x128xf32> -> vector<48x128xf32>
    %43 = arith.truncf %42 : vector<48x128xf32> to vector<48x128xbf16>
    %cst_25 = arith.constant dense<0.000000e+00> : vector<24x128xf32>
    %44 = tpu.matmul %8, %43, %cst_25 {dimension_numbers = #tpu.dot_dimension_numbers<[1], [0], [0], [1], [0, 0, 1, 1], [], []>} : vector<24x48xbf16>, vector<48x128xbf16>, vector<24x128xf32> -> vector<24x128xf32>
    %45 = arith.truncf %44 : vector<24x128xf32> to vector<24x128xbf16>
    %cst_26 = arith.constant dense<0.000000e+00> : vector<16x128xf32>
    %46 = tpu.matmul %14, %45, %cst_26 {dimension_numbers = #tpu.dot_dimension_numbers<[1], [0], [0], [1], [0, 0, 1, 1], [], []>} : vector<16x24xbf16>, vector<24x128xbf16>, vector<16x128xf32> -> vector<16x128xf32>
    %47 = vector.broadcast %20 : vector<16x1xf32> to vector<16x128xf32>
    %48 = arith.mulf %46, %47 : vector<16x128xf32>
    %cst_27 = arith.constant 0.000000e+00 : f32
    %49 = vector.broadcast %cst_27 : f32 to vector<16x128xf32>
    %50 = arith.maximumf %48, %49 : vector<16x128xf32>
    %c0_28 = arith.constant 0 : index
    %c0_29 = arith.constant 0 : index
    %51 = vector.load %arg5[%c0_28, %c0_29] : memref<32x128xf32, #tpu.memory_space<vmem>>, vector<32x128xf32>
    %cst_30 = arith.constant dense<0.000000e+00> : vector<16x128xf32>
    %52 = tpu.matmul %0, %51, %cst_30 {dimension_numbers = #tpu.dot_dimension_numbers<[1], [0], [0], [1], [0, 0, 1, 1], [], []>} : vector<16x32xf32>, vector<32x128xf32>, vector<16x128xf32> -> vector<16x128xf32>
    %53 = arith.addf %50, %52 : vector<16x128xf32>
    %c0_31 = arith.constant 0 : index
    %c0_32 = arith.constant 0 : index
    %54 = vector.load %arg6[%c0_31, %c0_32] : memref<1x128xf32, #tpu.memory_space<vmem>>, vector<1x128xf32>
    %55 = vector.broadcast %54 : vector<1x128xf32> to vector<16x128xf32>
    %56 = arith.addf %53, %55 : vector<16x128xf32>
    %cst_33 = arith.constant dense<0.000000e+00> : vector<16xf32>
    %57 = vector.multi_reduction <add>, %56, %cst_33 [1] : vector<16x128xf32> to vector<16xf32>
    %58 = vector.shape_cast %57 : vector<16xf32> to vector<16x1xf32>
    %cst_34 = arith.constant 3.125000e-02 : f32
    %59 = vector.broadcast %cst_34 : f32 to vector<16x1xf32>
    %60 = arith.mulf %58, %59 : vector<16x1xf32>
    %61 = arith.mulf %56, %56 : vector<16x128xf32>
    %cst_35 = arith.constant dense<0.000000e+00> : vector<16xf32>
    %62 = vector.multi_reduction <add>, %61, %cst_35 [1] : vector<16x128xf32> to vector<16xf32>
    %63 = vector.shape_cast %62 : vector<16xf32> to vector<16x1xf32>
    %cst_36 = arith.constant 3.125000e-02 : f32
    %64 = vector.broadcast %cst_36 : f32 to vector<16x1xf32>
    %65 = arith.mulf %63, %64 : vector<16x1xf32>
    %66 = arith.mulf %60, %60 : vector<16x1xf32>
    %67 = arith.subf %65, %66 : vector<16x1xf32>
    %68 = vector.broadcast %60 : vector<16x1xf32> to vector<16x128xf32>
    %69 = arith.subf %56, %68 : vector<16x128xf32>
    %cst_37 = arith.constant 9.99999974E-6 : f32
    %70 = vector.broadcast %cst_37 : f32 to vector<16x1xf32>
    %71 = arith.addf %67, %70 : vector<16x1xf32>
    %72 = math.rsqrt %71 : vector<16x1xf32>
    %73 = vector.broadcast %72 : vector<16x1xf32> to vector<16x128xf32>
    %74 = arith.mulf %69, %73 : vector<16x128xf32>
    %c0_38 = arith.constant 0 : index
    %c0_39 = arith.constant 0 : index
    %75 = vector.load %arg7[%c0_38, %c0_39] : memref<1x128xf32, #tpu.memory_space<vmem>>, vector<1x128xf32>
    %76 = vector.broadcast %75 : vector<1x128xf32> to vector<16x128xf32>
    %77 = arith.mulf %74, %76 : vector<16x128xf32>
    %c0_40 = arith.constant 0 : index
    %c0_41 = arith.constant 0 : index
    %78 = vector.load %arg8[%c0_40, %c0_41] : memref<1x128xf32, #tpu.memory_space<vmem>>, vector<1x128xf32>
    %79 = vector.broadcast %78 : vector<1x128xf32> to vector<16x128xf32>
    %80 = arith.addf %77, %79 : vector<16x128xf32>
    %c0_42 = arith.constant 0 : index
    %c0_43 = arith.constant 0 : index
    %c0_44 = arith.constant 0 : index
    %81 = vector.load %arg9[%c0_42, %c0_43, %c0_44] : memref<3x128x128xf32, #tpu.memory_space<vmem>>, vector<1x128x128xf32>
    %82 = vector.shape_cast %81 : vector<1x128x128xf32> to vector<128x128xf32>
    %cst_45 = arith.constant dense<0.000000e+00> : vector<16x128xf32>
    %83 = tpu.matmul %80, %82, %cst_45 {dimension_numbers = #tpu.dot_dimension_numbers<[1], [0], [0], [1], [0, 0, 1, 1], [], []>} : vector<16x128xf32>, vector<128x128xf32>, vector<16x128xf32> -> vector<16x128xf32>
    %c0_46 = arith.constant 0 : index
    %c0_47 = arith.constant 0 : index
    %c0_48 = arith.constant 0 : index
    %84 = vector.load %arg10[%c0_46, %c0_47, %c0_48] : memref<3x1x128xf32, #tpu.memory_space<vmem>>, vector<1x1x128xf32>
    %85 = vector.shape_cast %84 : vector<1x1x128xf32> to vector<1x128xf32>
    %86 = vector.broadcast %85 : vector<1x128xf32> to vector<16x128xf32>
    %87 = arith.addf %83, %86 : vector<16x128xf32>
    %c1_49 = arith.constant 1 : index
    %c0_50 = arith.constant 0 : index
    %c0_51 = arith.constant 0 : index
    %88 = vector.load %arg9[%c1_49, %c0_50, %c0_51] : memref<3x128x128xf32, #tpu.memory_space<vmem>>, vector<1x128x128xf32>
    %89 = vector.shape_cast %88 : vector<1x128x128xf32> to vector<128x128xf32>
    %cst_52 = arith.constant dense<0.000000e+00> : vector<16x128xf32>
    %90 = tpu.matmul %80, %89, %cst_52 {dimension_numbers = #tpu.dot_dimension_numbers<[1], [0], [0], [1], [0, 0, 1, 1], [], []>} : vector<16x128xf32>, vector<128x128xf32>, vector<16x128xf32> -> vector<16x128xf32>
    %c1_53 = arith.constant 1 : index
    %c0_54 = arith.constant 0 : index
    %c0_55 = arith.constant 0 : index
    %91 = vector.load %arg10[%c1_53, %c0_54, %c0_55] : memref<3x1x128xf32, #tpu.memory_space<vmem>>, vector<1x1x128xf32>
    %92 = vector.shape_cast %91 : vector<1x1x128xf32> to vector<1x128xf32>
    %93 = vector.broadcast %92 : vector<1x128xf32> to vector<16x128xf32>
    %94 = arith.addf %90, %93 : vector<16x128xf32>
    %c2_56 = arith.constant 2 : index
    %c0_57 = arith.constant 0 : index
    %c0_58 = arith.constant 0 : index
    %95 = vector.load %arg9[%c2_56, %c0_57, %c0_58] : memref<3x128x128xf32, #tpu.memory_space<vmem>>, vector<1x128x128xf32>
    %96 = vector.shape_cast %95 : vector<1x128x128xf32> to vector<128x128xf32>
    %cst_59 = arith.constant dense<0.000000e+00> : vector<16x128xf32>
    %97 = tpu.matmul %80, %96, %cst_59 {dimension_numbers = #tpu.dot_dimension_numbers<[1], [0], [0], [1], [0, 0, 1, 1], [], []>} : vector<16x128xf32>, vector<128x128xf32>, vector<16x128xf32> -> vector<16x128xf32>
    %c2_60 = arith.constant 2 : index
    %c0_61 = arith.constant 0 : index
    %c0_62 = arith.constant 0 : index
    %98 = vector.load %arg10[%c2_60, %c0_61, %c0_62] : memref<3x1x128xf32, #tpu.memory_space<vmem>>, vector<1x1x128xf32>
    %99 = vector.shape_cast %98 : vector<1x1x128xf32> to vector<1x128xf32>
    %100 = vector.broadcast %99 : vector<1x128xf32> to vector<16x128xf32>
    %101 = arith.addf %97, %100 : vector<16x128xf32>
    %102 = tpu.concatenate %87, %94, %101 in 0 : vector<16x128xf32>, vector<16x128xf32>, vector<16x128xf32> -> vector<48x128xf32>
    %103 = arith.truncf %102 : vector<48x128xf32> to vector<48x128xbf16>
    %cst_63 = arith.constant dense<0.000000e+00> : vector<24x128xf32>
    %104 = tpu.matmul %8, %103, %cst_63 {dimension_numbers = #tpu.dot_dimension_numbers<[1], [0], [0], [1], [0, 0, 1, 1], [], []>} : vector<24x48xbf16>, vector<48x128xbf16>, vector<24x128xf32> -> vector<24x128xf32>
    %105 = arith.truncf %104 : vector<24x128xf32> to vector<24x128xbf16>
    %cst_64 = arith.constant dense<0.000000e+00> : vector<16x128xf32>
    %106 = tpu.matmul %14, %105, %cst_64 {dimension_numbers = #tpu.dot_dimension_numbers<[1], [0], [0], [1], [0, 0, 1, 1], [], []>} : vector<16x24xbf16>, vector<24x128xbf16>, vector<16x128xf32> -> vector<16x128xf32>
    %107 = vector.broadcast %20 : vector<16x1xf32> to vector<16x128xf32>
    %108 = arith.mulf %106, %107 : vector<16x128xf32>
    %cst_65 = arith.constant 0.000000e+00 : f32
    %109 = vector.broadcast %cst_65 : f32 to vector<16x128xf32>
    %110 = arith.maximumf %108, %109 : vector<16x128xf32>
    %c0_66 = arith.constant 0 : index
    %c0_67 = arith.constant 0 : index
    %111 = vector.load %arg11[%c0_66, %c0_67] : memref<128x128xf32, #tpu.memory_space<vmem>>, vector<128x128xf32>
    %cst_68 = arith.constant dense<0.000000e+00> : vector<16x128xf32>
    %112 = tpu.matmul %80, %111, %cst_68 {dimension_numbers = #tpu.dot_dimension_numbers<[1], [0], [0], [1], [0, 0, 1, 1], [], []>} : vector<16x128xf32>, vector<128x128xf32>, vector<16x128xf32> -> vector<16x128xf32>
    %113 = arith.addf %110, %112 : vector<16x128xf32>
    %c0_69 = arith.constant 0 : index
    %c0_70 = arith.constant 0 : index
    %114 = vector.load %arg12[%c0_69, %c0_70] : memref<1x128xf32, #tpu.memory_space<vmem>>, vector<1x128xf32>
    %115 = vector.broadcast %114 : vector<1x128xf32> to vector<16x128xf32>
    %116 = arith.addf %113, %115 : vector<16x128xf32>
    %cst_71 = arith.constant dense<0.000000e+00> : vector<16xf32>
    %117 = vector.multi_reduction <add>, %116, %cst_71 [1] : vector<16x128xf32> to vector<16xf32>
    %118 = vector.shape_cast %117 : vector<16xf32> to vector<16x1xf32>
    %cst_72 = arith.constant 6.250000e-02 : f32
    %119 = vector.broadcast %cst_72 : f32 to vector<16x1xf32>
    %120 = arith.mulf %118, %119 : vector<16x1xf32>
    %121 = arith.mulf %116, %116 : vector<16x128xf32>
    %cst_73 = arith.constant dense<0.000000e+00> : vector<16xf32>
    %122 = vector.multi_reduction <add>, %121, %cst_73 [1] : vector<16x128xf32> to vector<16xf32>
    %123 = vector.shape_cast %122 : vector<16xf32> to vector<16x1xf32>
    %cst_74 = arith.constant 6.250000e-02 : f32
    %124 = vector.broadcast %cst_74 : f32 to vector<16x1xf32>
    %125 = arith.mulf %123, %124 : vector<16x1xf32>
    %126 = arith.mulf %120, %120 : vector<16x1xf32>
    %127 = arith.subf %125, %126 : vector<16x1xf32>
    %128 = vector.broadcast %120 : vector<16x1xf32> to vector<16x128xf32>
    %129 = arith.subf %116, %128 : vector<16x128xf32>
    %cst_75 = arith.constant 9.99999974E-6 : f32
    %130 = vector.broadcast %cst_75 : f32 to vector<16x1xf32>
    %131 = arith.addf %127, %130 : vector<16x1xf32>
    %132 = math.rsqrt %131 : vector<16x1xf32>
    %133 = vector.broadcast %132 : vector<16x1xf32> to vector<16x128xf32>
    %134 = arith.mulf %129, %133 : vector<16x128xf32>
    %c0_76 = arith.constant 0 : index
    %c0_77 = arith.constant 0 : index
    %135 = vector.load %arg13[%c0_76, %c0_77] : memref<1x128xf32, #tpu.memory_space<vmem>>, vector<1x128xf32>
    %136 = vector.broadcast %135 : vector<1x128xf32> to vector<16x128xf32>
    %137 = arith.mulf %134, %136 : vector<16x128xf32>
    %c0_78 = arith.constant 0 : index
    %c0_79 = arith.constant 0 : index
    %138 = vector.load %arg14[%c0_78, %c0_79] : memref<1x128xf32, #tpu.memory_space<vmem>>, vector<1x128xf32>
    %139 = vector.broadcast %138 : vector<1x128xf32> to vector<16x128xf32>
    %140 = arith.addf %137, %139 : vector<16x128xf32>
    %c0_80 = arith.constant 0 : index
    %c0_81 = arith.constant 0 : index
    %141 = vector.load %arg15[%c0_80, %c0_81] : memref<16x128xf32, #tpu.memory_space<vmem>>, vector<16x128xf32>
    tpu.vector_store %arg15[%c0_80, %c0_81], %140 {strides = array<i32>} : memref<16x128xf32, #tpu.memory_space<vmem>>, vector<16x128xf32>,
    return
  }
}

</mosaic_0001>

<bundles_post_ra>
// kernel: tpu_custom_call.1
= control target key start
LH: loop header
LB: loop body
LE: loop exit
PB: predicated region body
PF: predicated region fallthrough
CT: control target
= control target key end

     0   :  { %20 = vsyncpa [#allocation3], 0  ;;  %s1148_s0 = inlined_call_operand.vmem [shape: s32[24,1], index: 0, kind: input, shape index: {}]   ;;  %s1149_s1 = inlined_call_operand.vmem [shape: s32[1,24], index: 1, kind: input, shape index: {}]   ;;  %s1150_s2 = inlined_call_operand.vmem [shape: f32[16,32], index: 2, kind: input, shape index: {}]   ;;  %s1151_s3 = inlined_call_operand.hbm [shape: f32[3,32,128], index: 3, kind: input, shape index: {}]   ;;  %s1152_s4 = inlined_call_operand.vmem [shape: f32[3,1,128], index: 4, kind: input, shape index: {}]   ;;  %s1153_s5 = inlined_call_operand.hbm [shape: f32[32,128], index: 5, kind: input, shape index: {}]   ;;  %s1154_s6 = inlined_call_operand.vmem [shape: f32[1,128], index: 6, kind: input, shape index: {}]   ;;  %s1155_s7 = inlined_call_operand.vmem [shape: f32[1,128], index: 7, kind: input, shape index: {}]   ;;  %s1156_s8 = inlined_call_operand.vmem [shape: f32[1,128], index: 8, kind: input, shape index: {}]   ;;  %s1157_s9 = inlined_call_operand.hbm [shape: f32[3,128,128], index: 9, kind: input, shape index: {}]   ;;  %s1158_s10 = inlined_call_operand.vmem [shape: f32[3,1,128], index: 10, kind: input, shape index: {}]   ;;  %s1159_s11 = inlined_call_operand.hbm [shape: f32[128,128], index: 11, kind: input, shape index: {}]   ;;  %s1160_s12 = inlined_call_operand.vmem [shape: f32[1,128], index: 12, kind: input, shape index: {}]   ;;  %s1161_s13 = inlined_call_operand.vmem [shape: f32[1,128], index: 13, kind: input, shape index: {}]   ;;  %s1162_s14 = inlined_call_operand.vmem [shape: f32[1,128], index: 14, kind: input, shape index: {}]   ;;  %s1163_s15 = inlined_call_operand.hbm [shape: f32[16,128], index: 15, kind: output, shape index: {}]  }
   0x1   :  { %21 = vsyncpa [#allocation6], 0 }
   0x2   :  { %22 = vsyncpa [#allocation9], 0 }
   0x3   :  { %23 = vsyncpa [#allocation4], 0  ;;  %s49_s20 = sshll.u32 %s1153_s5, 4  ;;  %s907_s21 = smov [#allocation5]   ;;  %s50_s20 = int_to_ptr.hbm [resolvable:$true] %s49_s20 }
   0x4   :  { %s51_s22 = sshll.u32 %s907_s21, 4  ;;  %s34_s25 = sshll.u32 %s1151_s3, 4  ;;  %s52_s22 = int_to_ptr.vmem [resolvable:$true] %s51_s22  ;;  %s35_s25 = int_to_ptr.hbm [resolvable:$true] %s34_s25 }
   0x5   :  { %s908_s26 = smov 128   ;;  %s909_s27 = smov 8  }
   0x6   :  { %57 = dma.hbm_to_vmem [thread:$0]  %s50_s20, 512, %s52_s22, [#allocation6], %s908_s26, %s908_s26, %s909_s27  }
   0x7   :  { %s910_s28 = smov [#allocation2]   ;;  %s68_s5 = sshll.u32 %s1157_s9, 4  ;;  %s69_s5 = int_to_ptr.hbm [resolvable:$true] %s68_s5 }
   0x8   :  { %s36_s29 = sshll.u32 %s910_s28, 4  ;;  %s83_s18 = sshll.u32 %s1159_s11, 4  ;;  %s37_s29 = int_to_ptr.vmem [resolvable:$true] %s36_s29  ;;  %s84_s18 = int_to_ptr.hbm [resolvable:$true] %s83_s18 }
   0x9   :  { %42 = dma.hbm_to_vmem [thread:$0]  %s35_s25, 1536, %s37_s29, [#allocation3], %s908_s26, %s908_s26, %s909_s27  }
   0xa   :  { %s911_s19 = smov [#allocation7]   ;;  %s912_s20 = smov [#allocation8]  }
   0xb   :  { %s70_s21 = sshll.u32 %s911_s19, 4  ;;  %s85_s9 = sshll.u32 %s912_s20, 4  ;;  %s71_s21 = int_to_ptr.vmem [resolvable:$true] %s70_s21  ;;  %s86_s9 = int_to_ptr.vmem [resolvable:$true] %s85_s9 }
   0xc   :  { %76 = dma.hbm_to_vmem [thread:$0]  %s69_s5, 6144, %s71_s21, [#allocation6], %s908_s26, %s908_s26, %s909_s27  }
   0xd   :  { %91 = dma.hbm_to_vmem [thread:$0]  %s84_s18, 2048, %s86_s9, [#allocation9], %s908_s26, %s908_s26, %s909_s27  }
   0xe   :  { %899 = dma.done.wait [#allocation3], 1536  }
   0xf   :  { %900 = vsyncadd [#allocation3], 4294965760 }
  0x10   :  { %901 = dma.done.wait [#allocation6], 6656  }
  0x11   :  { %902 = vsyncadd [#allocation6], 4294960640 }
  0x12   :  { %903 = dma.done.wait [#allocation9], 2048  }
  0x13   :  { %904 = vsyncadd [#allocation9], 4294965248  ;;  %v913_v0 = vmov 0   ;;  %v209_v1 = vld [vmem:[#allocation2 + $0x38] sm:$0xff]  ;;  %v208_v3 = vld [vmem:[#allocation2 + $0x30] sm:$0xff]  ;;  %vm175_vm0 = vcmask 261120   ;;  %v121_v23 = vlaneseq }
  0x14   :  { %752 = vset.pattern.permute.xlu0 %v913_v0  ;;  %753 = vset.pattern.permute.xlu1 %v913_v0  ;;  %v242_v2 = vld [vmem:[#allocation2 + $0x58] sm:$0xff]  ;;  %v241_v4 = vld [vmem:[#allocation2 + $0x50] sm:$0xff]  ;;  %v207_v5 = vld [vmem:[#allocation2 + $0x28] sm:$0xff]  ;;  %v914_v39 = vmov 0.0   ;;  %vm274_vm3 = vcmask 392192   ;;  %vm156_vm7 = vcmask 195584  }
  0x15   :  { %227 = vmatpush.msra.mxu3 %v209_v1  ;;  %260 = vmatpush.msra.mxu2 %v242_v2  ;;  %v240_v6 = vld [vmem:[#allocation2 + $0x48] sm:$0xff]  ;;  %v170_v7 = vld [vmem:[#allocation2 + $0x18] sm:$0xff]  ;;  %v169_v8 = vld [vmem:[#allocation2 + $0x10] sm:$0xff]  ;;  %v122_v32 = vand.u32 127, %v121_v23  ;;  %v144_v47 = vshrl.u32 %v121_v23, 7  ;;  %vm304_vm8 = vcmask 1043456  }
  0x16   :  { %194 = vmatpush.msra.mxu0 %v170_v7  ;;  %v206_v9 = vld [vmem:[#allocation2 + $0x20] sm:$0xff]  ;;  %v168_v13 = vld [vmem:[#allocation2 + $0x8] sm:$0xff]  ;;  %v119_v15 = vld [vmem:[%s1148_s0 + $0x10] sm:$0xff]  ;;  %s705_s17 = sshll.u32 %s1163_s15, 4  ;;  %s706_s17 = int_to_ptr.hbm [resolvable:$true] %s705_s17 }
  0x17   :  { %228 = vmatpush.msra.mxu3 %v208_v3  ;;  %261 = vmatpush.msra.mxu2 %v241_v4  ;;  %v239_v10 = vld [vmem:[#allocation2 + $0x40] sm:$0xff]  ;;  %v118_v16 = vld [vmem:[%s1148_s0 + $0x8] sm:$0xff]  ;;  %v145_v48 = vadd.s32 8, %v144_v47  ;;  %v329_v50 = vld [vmem:[#allocation5 + $0x18] sm:$0xff] }
  0x18   :  { %v117_v11 = vld [vmem:[%s1148_s0] sm:$0xff]  ;;  %195 = vmatpush.msra.mxu0 %v169_v8  ;;  %130 = vperm.xlu1 %753, %v119_v15   ;;  %v1043_v17 = vld [vmem:[%s1150_s2 + $0x8] sm:$0xff]  ;;  %v328_v51 = vld [vmem:[#allocation5 + $0x10] sm:$0xff]  ;;  %s915_s0 = smov [#allocation10]  }
  0x19   :  { %229 = vmatpush.msra.mxu3 %v207_v5  ;;  %262 = vmatpush.msra.mxu2 %v240_v6  ;;  %v1026_v12 = vld [vmem:[%s1150_s2] sm:$0xff]  ;;  %v327_v54 = vld [vmem:[#allocation5 + $0x8] sm:$0xff]  ;;  %v432_v23 = vld [vmem:[#allocation7 + $0x78] sm:$0xff] }
  0x1a   :  { %v167_v14 = vld [vmem:[#allocation2] sm:$0xff]  ;;  %124 = vperm.xlu0 %752, %v117_v11   ;;  %196 = vmatpush.msra.mxu0 %v168_v13 }
  0x1b   :  { %230 = vmatpush.msra.mxu3 %v206_v9  ;;  %263 = vmatpush.msra.mxu2 %v239_v10  ;;  %v756_v22 = vld [vmem:[%s1152_s4 + $0x2] ss:$0 sm:$0xff]  ;;  %v755_v26 = vld [vmem:[%s1152_s4 + $0x1] ss:$0 sm:$0xff]  ;;  %v754_v29 = vld [vmem:[%s1152_s4] ss:$0 sm:$0xff] }
  0x1c   :  { %728 = vmatmul.msk.f32.vlgmr.msra.gmra.mxu3 %vm175_vm0, %v1026_v12  ;;  %731 = vmatmul.msk.f32.vlgmr.msra.gmra.mxu2 %vm175_vm0, %v1026_v12  ;;  %v757_v49 = vld [vmem:[%s1149_s1] ss:$0 sm:$0xff] }
  0x1d   :  { %197 = vmatpush.msra.mxu0 %v167_v14  ;;  %vm147_vm5 = vcmp.eq.s32.totalorder %v144_v47, %v757_v49  ;;  %vm148_vm6 = vcmp.eq.s32.totalorder %v145_v48, %v757_v49  ;;  %342 = vmatpush.msra.mxu1 %v329_v50  ;;  %v326_v56 = vld [vmem:[#allocation5] sm:$0xff]  ;;  %v424_v49 = vld [vmem:[#allocation7 + $0x38] sm:$0xff] }
  0x1e   :  { %725 = vmatmul.msk.f32.vlgmr.msra.gmra.mxu0 %vm175_vm0, %v1026_v12  ;;  %v723_v52 = vsel %vm147_vm5, 1.0, %v914_v39  ;;  %v724_v53 = vsel %vm148_vm6, 1.0, %v914_v39  ;;  %v758_v11 = vld [vmem:[%s1154_s6] ss:$0 sm:$0xff]  ;;  %437 = vmatpush.msrb.mxu2 %v432_v23  ;;  %v468_v50 = vld [vmem:[#allocation7 + $0xb8] sm:$0xff] }
  0x1f   :  { %343 = vmatpush.msra.mxu1 %v328_v51  ;;  %v157_v55 = vsel %vm156_vm7, %v723_v52, 0.0  ;;  %v160_v57 = vsel %vm156_vm7, %v724_v53, 0.0  ;;  %v1078_v0 = vpack.c.bf16 %v724_v53, %v723_v52  ;;  %v469_v47 = vld [vmem:[#allocation7 + $0xc0] sm:$0xff]  ;;  %v513_v51 = vld [vmem:[#allocation7 + $0x138] sm:$0xff]  ;;  %v423_v52 = vld [vmem:[#allocation7 + $0x30] sm:$0xff] }
  0x20   :  { %161 = vadd.xlane.f32.xlu2 %v160_v57  ;;  %v514_v48 = vld [vmem:[#allocation7 + $0x140] sm:$0xff]  ;;  %v467_v53 = vld [vmem:[#allocation7 + $0xb0] sm:$0xff]  ;;  %v511_v57 = vld [vmem:[#allocation7 + $0x128] sm:$0xff] }
  0x21   :  { %344 = vmatpush.msra.mxu1 %v327_v54  ;;  %v512_v54 = vld [vmem:[#allocation7 + $0x130] sm:$0xff] }
  0x22   :  { %127 = vperm.xlu0 %752, %v118_v16  }
  0x23   :  { %345 = vmatpush.msra.mxu1 %v326_v56  ;;  %v466_v56 = vld [vmem:[#allocation7 + $0xa8] sm:$0xff] }
  0x24   :  { %729 = vmatmul.msk.f32.gmra.mxu3 %vm175_vm0, %v1043_v17  ;;  %732 = vmatmul.msk.f32.gmra.mxu2 %vm175_vm0, %v1043_v17 }
  0x25   :  { %736 = vmatmul.msk.f32.vlgmr.msra.gmra.mxu1 %vm175_vm0, %v1026_v12 }
  0x26   :  { %726 = vmatmul.msk.f32.gmra.mxu0 %vm175_vm0, %v1043_v17 }
  0x2d   :  { %737 = vmatmul.msk.f32.gmra.mxu1 %vm175_vm0, %v1043_v17 }
  0x42   :  { %158 = vadd.xlane.f32.xlu1 %v157_v55  ;;  %v422_v55 = vld [vmem:[#allocation7 + $0x28] sm:$0xff] }
  0x8a   :  { %v131_v44 = vpop.permute.xlu1 %130 }
  0x8b   :  { %vm134_vm4 = vcmp.eq.s32.totalorder %v122_v32, %v131_v44  ;;  %v515_v44 = vld [vmem:[#allocation7 + $0x148] sm:$0xff] }
  0x8c   :  { %v125_v21 = vpop.permute.xlu0 %124  ;;  %v722_v45 = vsel %vm134_vm4, 1.0, %v914_v39 }
  0x8d   :  { %vm132_vm1 = vcmp.eq.s32.totalorder %v122_v32, %v125_v21  ;;  %v1064_v46 = vpack.c.bf16 %v722_v45, %v722_v45  ;;  %v425_v45 = vld [vmem:[#allocation7 + $0x40] sm:$0xff] }
  0x8e   :  { %v720_v40 = vsel %vm132_vm1, 1.0, %v914_v39 }
  0x93   :  { %v162_v4 = vpop.xlane.xlu2 %161 }
  0x94   :  { %v128_v35 = vpop.permute.xlu0 %127  ;;  %v164_v5 = vmax.f32 %v162_v4, 1.0  ;;  %v418_v4 = vld [vmem:[#allocation7 + $0x8] sm:$0xff] }
  0x95   :  { %vm133_vm2 = vcmp.eq.s32.totalorder %v122_v32, %v128_v35  ;;  %v429_v32 = vld [vmem:[#allocation7 + $0x60] sm:$0xff]  ;;  %v428_v35 = vld [vmem:[#allocation7 + $0x58] sm:$0xff] }
  0x96   :  { %v721_v41 = vsel %vm133_vm2, 1.0, %v914_v39  ;;  %v471_v39 = vld [vmem:[#allocation7 + $0xd0] sm:$0xff] }
  0x97   :  { %v1060_v43 = vpack.c.bf16 %v721_v41, %v720_v40  ;;  %v516_v40 = vld [vmem:[#allocation7 + $0x150] sm:$0xff]  ;;  %v426_v41 = vld [vmem:[#allocation7 + $0x48] sm:$0xff] }
  0x9b   :  { %v199_v20 = vpop.f32.mrf.mxu0 }
  0x9c   :  { %v200_v36 = vadd.f32 %v754_v29, %v199_v20 }
  0x9f   :  { %v232_v18 = vpop.f32.mrf.mxu3  ;;  %v265_v19 = vpop.f32.mrf.mxu2 }
  0xa0   :  { %v266_v27 = vadd.f32 %v756_v22, %v265_v19  ;;  %v233_v34 = vadd.f32 %v755_v26, %v232_v18 }
  0xa2   :  { %v347_v8 = vpop.f32.mrf.mxu1 }
  0xa3   :  { %v202_v33 = vpop.f32.mrf.mxu0 }
  0xa4   :  { %v203_v37 = vadd.f32 %v754_v29, %v202_v33  ;;  %v430_v29 = vld [vmem:[#allocation7 + $0x68] sm:$0xff]  ;;  %v473_v33 = vld [vmem:[#allocation7 + $0xe0] sm:$0xff] }
  0xa6   :  { %v271_v42 = vpack.c.bf16 %v203_v37, %v200_v36  ;;  %v472_v36 = vld [vmem:[#allocation7 + $0xd8] sm:$0xff] }
  0xa7   :  { %v235_v24 = vpop.f32.mrf.mxu3  ;;  %v268_v25 = vpop.f32.mrf.mxu2  ;;  %v517_v37 = vld [vmem:[#allocation7 + $0x158] sm:$0xff] }
  0xa8   :  { %v269_v28 = vadd.f32 %v756_v22, %v268_v25  ;;  %v236_v30 = vadd.f32 %v755_v26, %v235_v24  ;;  %v476_v24 = vld [vmem:[#allocation7 + $0xf8] sm:$0xff]  ;;  %v431_v26 = vld [vmem:[#allocation7 + $0x70] sm:$0xff] }
  0xa9   :  { %v521_v25 = vld [vmem:[#allocation7 + $0x178] sm:$0xff]  ;;  %438 = vmatpush.msrb.mxu2 %v431_v26 }
  0xaa   :  { %v273_v31 = vpack.c.bf16 %v269_v28, %v266_v27  ;;  %v272_v38 = vpack.c.bf16 %v236_v30, %v233_v34  ;;  %v350_v18 = vpop.f32.mrf.mxu1  ;;  %v475_v27 = vld [vmem:[#allocation7 + $0xf0] sm:$0xff]  ;;  %v474_v30 = vld [vmem:[#allocation7 + $0xe8] sm:$0xff]  ;;  %v518_v34 = vld [vmem:[#allocation7 + $0x160] sm:$0xff] }
  0xab   :  { %v520_v28 = vld [vmem:[#allocation7 + $0x170] sm:$0xff]  ;;  %439 = vmatpush.msrb.mxu2 %v430_v29 }
  0xac   :  { %286 = vmatpush.bf16.msrb.mxu3 %v273_v31  ;;  %v519_v31 = vld [vmem:[#allocation7 + $0x168] sm:$0xff] }
  0xad   :  { %440 = vmatpush.msrb.mxu2 %v429_v32 }
  0xaf   :  { %441 = vmatpush.msrb.mxu2 %v428_v35  ;;  %v759_v35 = vld [vmem:[%s1155_s7] ss:$0 sm:$0xff] }
  0xb0   :  { %287 = vmatpush.bf16.msrb.mxu3 %v272_v38  ;;  %v427_v38 = vld [vmem:[#allocation7 + $0x50] sm:$0xff] }
  0xb1   :  { %442 = vmatpush.msrb.mxu2 %v427_v38  ;;  %v760_v38 = vld [vmem:[%s1156_s8] ss:$0 sm:$0xff] }
  0xb3   :  { %443 = vmatpush.msrb.mxu2 %v426_v41 }
  0xb4   :  { %288 = vmatpush.bf16.msrb.mxu3 %v271_v42  ;;  %v470_v42 = vld [vmem:[#allocation7 + $0xc8] sm:$0xff] }
  0xb5   :  { %v159_v2 = vpop.xlane.xlu1 %158  ;;  %444 = vmatpush.msrb.mxu2 %v425_v45 }
  0xb6   :  { %v163_v3 = vmax.f32 %v159_v2, 1.0  ;;  %v463_v2 = vld [vmem:[#allocation7 + $0x90] sm:$0xff] }
  0xb7   :  { %733 = vmatmul.msk.bf16.vlgmr.msrb.gmra.mxu3 %vm274_vm3, %v1060_v43  ;;  %445 = vmatpush.msrb.mxu2 %v424_v49 }
  0xb8   :  { %767 = vrcp.f32 %v163_v3  ;;  %482 = vmatpush.msra.mxu3 %v476_v24  ;;  %v508_v3 = vld [vmem:[#allocation7 + $0x110] sm:$0xff] }
  0xb9   :  { %769 = vrcp.f32 %v164_v5  ;;  %446 = vmatpush.msrb.mxu2 %v423_v52  ;;  %v462_v5 = vld [vmem:[#allocation7 + $0x88] sm:$0xff] }
  0xba   :  { %483 = vmatpush.msra.mxu3 %v475_v27 }
  0xbb   :  { %447 = vmatpush.msrb.mxu2 %v422_v55 }
  0xbc   :  { %484 = vmatpush.msra.mxu3 %v474_v30 }
  0xbe   :  { %v1082_v6 = vpop.eup %767  ;;  %485 = vmatpush.msra.mxu3 %v473_v33 }
  0xbf   :  { %v1088_v13 = vpop.eup %769 }
  0xc0   :  { %486 = vmatpush.msra.mxu3 %v472_v36 }
  0xc2   :  { %487 = vmatpush.msra.mxu3 %v471_v39 }
  0xc4   :  { %488 = vmatpush.msra.mxu3 %v470_v42 }
  0xc6   :  { %489 = vmatpush.msra.mxu3 %v469_v47 }
  0xc7   :  { %734 = vmatmul.msk.bf16.gmra.mxu3 %vm274_vm3, %v1064_v46 }
  0xc8   :  { %490 = vmatpush.msra.mxu3 %v468_v50 }
  0xca   :  { %491 = vmatpush.msra.mxu3 %v467_v53 }
  0xcc   :  { %492 = vmatpush.msra.mxu3 %v466_v56 }
 0x13a   :  { %v290_v58 = vpop.f32.mrf.mxu3 }
 0x142   :  { %v292_v59 = vpop.f32.mrf.mxu3 }
 0x143   :  { %v299_v63 = vpack.c.bf16 %v292_v59, %v290_v58  ;;  %v421_v58 = vld [vmem:[#allocation7 + $0x20] sm:$0xff] }
 0x144   :  { %v465_v59 = vld [vmem:[#allocation7 + $0xa0] sm:$0xff]  ;;  %448 = vmatpush.msrb.mxu2 %v421_v58 }
 0x145   :  { %493 = vmatpush.msra.mxu3 %v465_v59 }
 0x14a   :  { %v295_v60 = vpop.f32.mrf.mxu3 }
 0x14b   :  { %v300_v61 = vpack.c.bf16 %v295_v60, %v295_v60  ;;  %v510_v60 = vld [vmem:[#allocation7 + $0x120] sm:$0xff] }
 0x14d   :  { %v306_v62 = vsel %vm304_vm8, %v300_v61, 0  ;;  %v420_v61 = vld [vmem:[#allocation7 + $0x18] sm:$0xff] }
 0x14e   :  { %314 = vmatpush.bf16.msrb.mxu0 %v306_v62  ;;  %v464_v62 = vld [vmem:[#allocation7 + $0x98] sm:$0xff]  ;;  %449 = vmatpush.msrb.mxu2 %v420_v61 }
 0x14f   :  { %494 = vmatpush.msra.mxu3 %v464_v62 }
 0x151   :  { %495 = vmatpush.msra.mxu3 %v463_v2 }
 0x152   :  { %v297_v1 = vpop.f32.mrf.mxu3  ;;  %315 = vmatpush.bf16.msrb.mxu0 %v299_v63  ;;  %v509_v63 = vld [vmem:[#allocation7 + $0x118] sm:$0xff] }
 0x153   :  { %v419_v1 = vld [vmem:[#allocation7 + $0x10] sm:$0xff]  ;;  %496 = vmatpush.msra.mxu3 %v462_v5 }
 0x154   :  { %450 = vmatpush.msrb.mxu2 %v419_v1 }
 0x155   :  { %735 = vmatmul.msk.bf16.vlgmr.msrb.gmra.mxu0 %vm156_vm7, %v1078_v0 }
 0x156   :  { %527 = vmatpush.msra.mxu0 %v521_v25  ;;  %451 = vmatpush.msrb.mxu2 %v418_v4 }
 0x158   :  { %528 = vmatpush.msra.mxu0 %v520_v28 }
 0x15a   :  { %529 = vmatpush.msra.mxu0 %v519_v31 }
 0x15c   :  { %530 = vmatpush.msra.mxu0 %v518_v34 }
 0x15e   :  { %531 = vmatpush.msra.mxu0 %v517_v37 }
 0x160   :  { %532 = vmatpush.msra.mxu0 %v516_v40 }
 0x162   :  { %533 = vmatpush.msra.mxu0 %v515_v44 }
 0x164   :  { %534 = vmatpush.msra.mxu0 %v514_v48 }
 0x166   :  { %535 = vmatpush.msra.mxu0 %v513_v51 }
 0x168   :  { %536 = vmatpush.msra.mxu0 %v512_v54  ;;  %v761_v54 = vld [vmem:[%s1158_s10 + $0x2] ss:$0 sm:$0xff] }
 0x16a   :  { %537 = vmatpush.msra.mxu0 %v511_v57 }
 0x16c   :  { %538 = vmatpush.msra.mxu0 %v510_v60 }
 0x16e   :  { %539 = vmatpush.msra.mxu0 %v509_v63  ;;  %v762_v63 = vld [vmem:[%s1158_s10] ss:$0 sm:$0xff] }
 0x170   :  { %540 = vmatpush.msra.mxu0 %v508_v3 }
 0x1d2   :  { %v317_v7 = vpop.f32.mrf.mxu0 }
 0x1d3   :  { %v322_v9 = vmul.f32 %v1082_v6, %v317_v7  ;;  %v507_v7 = vld [vmem:[#allocation7 + $0x108] sm:$0xff] }
 0x1d4   :  { %541 = vmatpush.msra.mxu0 %v507_v7 }
 0x1d5   :  { %v324_v10 = vmax.f32 %v322_v9, 0.0  ;;  %v461_v9 = vld [vmem:[#allocation7 + $0x80] sm:$0xff] }
 0x1d6   :  { %497 = vmatpush.msra.mxu3 %v461_v9  ;;  %v608_v9 = vld [vmem:[#allocation8 + $0x70] sm:$0xff] }
 0x1d7   :  { %v353_v12 = vadd.f32 %v347_v8, %v324_v10  ;;  %v417_v8 = vld [vmem:[#allocation7] sm:$0xff] }
 0x1d8   :  { %v506_v10 = vld [vmem:[#allocation7 + $0x100] sm:$0xff]  ;;  %452 = vmatpush.msrb.mxu2 %v417_v8  ;;  %v609_v8 = vld [vmem:[#allocation8 + $0x78] sm:$0xff] }
 0x1d9   :  { %v1090_v14 = vadd.f32 %v758_v11, %v353_v12  ;;  %542 = vmatpush.msra.mxu0 %v506_v10  ;;  %v607_v10 = vld [vmem:[#allocation8 + $0x68] sm:$0xff] }
 0x1da   :  { %v319_v15 = vpop.f32.mrf.mxu0 }
 0x1db   :  { %v323_v16 = vmul.f32 %v1088_v13, %v319_v15  ;;  %361 = vadd.xlane.f32.xlu2 %v1090_v14  ;;  %v367_v17 = vmul.f32 %v1090_v14, %v1090_v14 }
 0x1dd   :  { %v325_v19 = vmax.f32 %v323_v16, 0.0  ;;  %369 = vadd.xlane.f32.xlu0 %v367_v17 }
 0x1df   :  { %v354_v20 = vadd.f32 %v350_v18, %v325_v19 }
 0x1e1   :  { %v1096_v21 = vadd.f32 %v758_v11, %v354_v20 }
 0x1e3   :  { %363 = vadd.xlane.f32.xlu2 %v1096_v21  ;;  %v368_v22 = vmul.f32 %v1096_v21, %v1096_v21 }
 0x1eb   :  { %371 = vadd.xlane.f32.xlu2 %v368_v22 }
 0x24e   :  { %v362_v11 = vpop.xlane.xlu2 %361 }
 0x24f   :  { %v365_v12 = vmul.f32 0.03125, %v362_v11  ;;  %v606_v11 = vld [vmem:[#allocation8 + $0x60] sm:$0xff] }
 0x250   :  { %v370_v15 = vpop.xlane.xlu0 %369 }
 0x251   :  { %v375_v16 = vmul.f32 %v365_v12, %v365_v12  ;;  %v373_v17 = vmul.f32 0.03125, %v370_v15  ;;  %v379_v34 = vsub.f32 %v1090_v14, %v365_v12  ;;  %v605_v12 = vld [vmem:[#allocation8 + $0x58] sm:$0xff]  ;;  %v604_v15 = vld [vmem:[#allocation8 + $0x50] sm:$0xff] }
 0x253   :  { %v377_v18 = vsub.f32 %v373_v17, %v375_v16  ;;  %v603_v16 = vld [vmem:[#allocation8 + $0x48] sm:$0xff]  ;;  %v602_v17 = vld [vmem:[#allocation8 + $0x40] sm:$0xff] }
 0x255   :  { %v381_v19 = vadd.f32 1e-05, %v377_v18  ;;  %v601_v18 = vld [vmem:[#allocation8 + $0x38] sm:$0xff] }
 0x256   :  { %v364_v20 = vpop.xlane.xlu2 %363 }
 0x257   :  { %771 = vrsqrt.f32 %v381_v19  ;;  %v366_v22 = vmul.f32 0.03125, %v364_v20  ;;  %vm389_vm10 = vweird.f32 %v381_v19  ;;  %v598_v20 = vld [vmem:[#allocation8 + $0x20] sm:$0xff] }
 0x259   :  { %v376_v26 = vmul.f32 %v366_v22, %v366_v22  ;;  %v380_v48 = vsub.f32 %v1096_v21, %v366_v22  ;;  %v763_v21 = vld [vmem:[%s1158_s10 + $0x1] ss:$0 sm:$0xff]  ;;  %v597_v22 = vld [vmem:[#allocation8 + $0x18] sm:$0xff] }
 0x25d   :  { %v772_v23 = vpop.eup %771 }
 0x25e   :  { %v384_v24 = vmul.f32 %v772_v23, %v381_v19  ;;  %v372_v25 = vpop.xlane.xlu2 %371  ;;  %vm390_vm9 = vweird.f32 %v772_v23  ;;  %v600_v19 = vld [vmem:[#allocation8 + $0x30] sm:$0xff] }
 0x25f   :  { %v374_v27 = vmul.f32 0.03125, %v372_v25  ;;  %vm391_vm11 = vmor %vm389_vm10, %vm390_vm9  ;;  %v594_v25 = vld [vmem:[#allocation8] sm:$0xff] }
 0x260   :  { %v385_v28 = vmul.f32 %v772_v23, %v384_v24  ;;  %v595_v24 = vld [vmem:[#allocation8 + $0x8] sm:$0xff] }
 0x261   :  { %v378_v29 = vsub.f32 %v374_v27, %v376_v26 }
 0x262   :  { %v386_v30 = vmul.f32 0.5, %v385_v28 }
 0x263   :  { %v382_v31 = vadd.f32 1e-05, %v378_v29 }
 0x264   :  { %v387_v32 = vsub.f32 1.5, %v386_v30 }
 0x265   :  { %773 = vrsqrt.f32 %v382_v31  ;;  %vm399_vm13 = vweird.f32 %v382_v31 }
 0x266   :  { %v388_v33 = vmul.f32 %v772_v23, %v387_v32 }
 0x268   :  { %v392_v36 = vsel %vm391_vm11, %v772_v23, %v388_v33  ;;  %v596_v23 = vld [vmem:[#allocation8 + $0x10] sm:$0xff] }
 0x269   :  { %v403_v37 = vmul.f32 %v392_v36, %v379_v34  ;;  %v764_v36 = vld [vmem:[%s1160_s12] ss:$0 sm:$0xff] }
 0x26b   :  { %v774_v39 = vpop.eup %773  ;;  %v409_v40 = vmul.f32 %v759_v35, %v403_v37 }
 0x26c   :  { %v394_v41 = vmul.f32 %v774_v39, %v382_v31  ;;  %vm400_vm12 = vweird.f32 %v774_v39 }
 0x26d   :  { %v1108_v42 = vadd.f32 %v760_v38, %v409_v40  ;;  %vm401_vm14 = vmor %vm399_vm13, %vm400_vm12 }
 0x26e   :  { %v395_v44 = vmul.f32 %v774_v39, %v394_v41 }
 0x26f   :  { %453 = vmatmul.f32.vlgmr.msrb.gmra.mxu2 %v1108_v42  ;;  %498 = vmatmul.f32.vlgmr.msra.gmra.mxu3 %v1108_v42 }
 0x270   :  { %v396_v14 = vmul.f32 0.5, %v395_v44  ;;  %543 = vmatmul.f32.vlgmr.msra.gmra.mxu0 %v1108_v42 }
 0x272   :  { %v397_v45 = vsub.f32 1.5, %v396_v14 }
 0x274   :  { %v398_v47 = vmul.f32 %v774_v39, %v397_v45 }
 0x276   :  { %v402_v49 = vsel %vm401_vm14, %v774_v39, %v398_v47 }
 0x277   :  { %v404_v50 = vmul.f32 %v402_v49, %v380_v48 }
 0x279   :  { %v410_v51 = vmul.f32 %v759_v35, %v404_v50 }
 0x27b   :  { %v416_v52 = vadd.f32 %v760_v38, %v410_v51 }
 0x27d   :  { %456 = vmatmul.f32.gmra.mxu2 %v416_v52  ;;  %501 = vmatmul.f32.gmra.mxu3 %v416_v52 }
 0x27e   :  { %546 = vmatmul.f32.gmra.mxu0 %v416_v52 }
 0x2ed   :  { %v544_v53 = vpop.f32.mrf.mxu0 }
 0x2ee   :  { %v545_v58 = vadd.f32 %v761_v54, %v544_v53 }
 0x2f2   :  { %v454_v55 = vpop.f32.mrf.mxu2  ;;  %v499_v56 = vpop.f32.mrf.mxu3 }
 0x2f3   :  { %v500_v1 = vadd.f32 %v763_v21, %v499_v56  ;;  %v455_v5 = vadd.f32 %v762_v63, %v454_v55 }
 0x2fb   :  { %v547_v57 = vpop.f32.mrf.mxu0 }
 0x2fc   :  { %v548_v59 = vadd.f32 %v761_v54, %v547_v57 }
 0x2fe   :  { %v552_v60 = vpack.c.bf16 %v548_v59, %v545_v58 }
 0x300   :  { %558 = vmatpush.bf16.msrb.mxu1 %v552_v60  ;;  %v457_v61 = vpop.f32.mrf.mxu2  ;;  %v502_v62 = vpop.f32.mrf.mxu3 }
 0x301   :  { %v503_v2 = vadd.f32 %v763_v21, %v502_v62  ;;  %v458_v3 = vadd.f32 %v762_v63, %v457_v61 }
 0x303   :  { %v551_v4 = vpack.c.bf16 %v503_v2, %v500_v1  ;;  %v550_v7 = vpack.c.bf16 %v458_v3, %v455_v5  ;;  %v765_v5 = vld [vmem:[%s1161_s13] ss:$0 sm:$0xff]  ;;  %s703_s13 = sshll.u32 %s915_s0, 4  ;;  %s704_s13 = int_to_ptr.vmem [resolvable:$true] %s703_s13 }
 0x305   :  { %559 = vmatpush.bf16.msrb.mxu1 %v551_v4 }
 0x309   :  { %560 = vmatpush.bf16.msrb.mxu1 %v550_v7 }
 0x30c   :  { %740 = vmatmul.msk.bf16.vlgmr.msrb.gmra.mxu1 %vm274_vm3, %v1060_v43  ;;  %v599_v43 = vld [vmem:[#allocation8 + $0x28] sm:$0xff] }
 0x30d   :  { %610 = vmatpush.msra.mxu1 %v609_v8 }
 0x30f   :  { %611 = vmatpush.msra.mxu1 %v608_v9 }
 0x311   :  { %612 = vmatpush.msra.mxu1 %v607_v10  ;;  %v766_v10 = vld [vmem:[%s1162_s14] ss:$0 sm:$0xff] }
 0x313   :  { %613 = vmatpush.msra.mxu1 %v606_v11 }
 0x315   :  { %614 = vmatpush.msra.mxu1 %v605_v12 }
 0x317   :  { %615 = vmatpush.msra.mxu1 %v604_v15 }
 0x319   :  { %616 = vmatpush.msra.mxu1 %v603_v16 }
 0x31b   :  { %617 = vmatpush.msra.mxu1 %v602_v17 }
 0x31c   :  { %741 = vmatmul.msk.bf16.gmra.mxu1 %vm274_vm3, %v1064_v46 }
 0x31d   :  { %618 = vmatpush.msra.mxu1 %v601_v18 }
 0x31f   :  { %619 = vmatpush.msra.mxu1 %v600_v19 }
 0x321   :  { %620 = vmatpush.msra.mxu1 %v599_v43 }
 0x323   :  { %621 = vmatpush.msra.mxu1 %v598_v20 }
 0x325   :  { %622 = vmatpush.msra.mxu1 %v597_v22 }
 0x327   :  { %623 = vmatpush.msra.mxu1 %v596_v23 }
 0x329   :  { %624 = vmatpush.msra.mxu1 %v595_v24 }
 0x32b   :  { %625 = vmatpush.msra.mxu1 %v594_v25 }
 0x32c   :  { %626 = vmatmul.f32.vlgmr.msra.gmra.mxu1 %v1108_v42 }
 0x334   :  { %629 = vmatmul.f32.gmra.mxu1 %v416_v52 }
 0x389   :  { %v562_v26 = vpop.f32.mrf.mxu1 }
 0x391   :  { %v564_v27 = vpop.f32.mrf.mxu1 }
 0x392   :  { %v571_v30 = vpack.c.bf16 %v564_v27, %v562_v26 }
 0x399   :  { %v567_v28 = vpop.f32.mrf.mxu1 }
 0x39a   :  { %v572_v46 = vpack.c.bf16 %v567_v28, %v567_v28 }
 0x39c   :  { %v574_v29 = vsel %vm304_vm8, %v572_v46, 0 }
 0x39d   :  { %582 = vmatpush.bf16.msra.mxu2 %v574_v29 }
 0x3a1   :  { %v569_v31 = vpop.f32.mrf.mxu1  ;;  %583 = vmatpush.bf16.msra.mxu2 %v571_v30 }
 0x3a4   :  { %742 = vmatmul.msk.bf16.vlgmr.msra.gmra.mxu2 %vm156_vm7, %v1078_v0 }
 0x3a9   :  { %v627_v34 = vpop.f32.mrf.mxu1 }
 0x3b1   :  { %v630_v42 = vpop.f32.mrf.mxu1 }
 0x427   :  { %v585_v32 = vpop.f32.mrf.mxu2 }
 0x428   :  { %v590_v33 = vmul.f32 %v1082_v6, %v585_v32 }
 0x42a   :  { %v592_v35 = vmax.f32 %v590_v33, 0.0 }
 0x42c   :  { %v633_v37 = vadd.f32 %v627_v34, %v592_v35 }
 0x42e   :  { %v639_v38 = vadd.f32 %v764_v36, %v633_v37 }
 0x42f   :  { %v587_v39 = vpop.f32.mrf.mxu2 }
 0x430   :  { %v591_v40 = vmul.f32 %v1088_v13, %v587_v39  ;;  %641 = vadd.xlane.f32.xlu2 %v639_v38  ;;  %v647_v6 = vmul.f32 %v639_v38, %v639_v38 }
 0x432   :  { %v593_v41 = vmax.f32 %v591_v40, 0.0 }
 0x434   :  { %v634_v44 = vadd.f32 %v630_v42, %v593_v41 }
 0x436   :  { %v640_v14 = vadd.f32 %v764_v36, %v634_v44 }
 0x438   :  { %643 = vadd.xlane.f32.xlu2 %v640_v14  ;;  %v648_v0 = vmul.f32 %v640_v14, %v640_v14 }
 0x43a   :  { %651 = vadd.xlane.f32.xlu1 %v648_v0 }
 0x440   :  { %649 = vadd.xlane.f32.xlu2 %v647_v6 }
 0x4a3   :  { %v642_v45 = vpop.xlane.xlu2 %641 }
 0x4a4   :  { %v645_v52 = vmul.f32 0.0625, %v642_v45 }
 0x4a6   :  { %v655_v55 = vmul.f32 %v645_v52, %v645_v52  ;;  %v659_v16 = vsub.f32 %v639_v38, %v645_v52 }
 0x4ab   :  { %v644_v47 = vpop.xlane.xlu2 %643 }
 0x4ac   :  { %v646_v48 = vmul.f32 0.0625, %v644_v47 }
 0x4ad   :  { %v652_v49 = vpop.xlane.xlu1 %651 }
 0x4ae   :  { %v656_v50 = vmul.f32 %v646_v48, %v646_v48  ;;  %v654_v51 = vmul.f32 0.0625, %v652_v49  ;;  %v660_v4 = vsub.f32 %v640_v14, %v646_v48 }
 0x4b0   :  { %v658_v53 = vsub.f32 %v654_v51, %v656_v50 }
 0x4b2   :  { %v662_v54 = vadd.f32 1e-05, %v658_v53 }
 0x4b3   :  { %v650_v13 = vpop.xlane.xlu2 %649 }
 0x4b4   :  { %775 = vrsqrt.f32 %v662_v54  ;;  %v653_v56 = vmul.f32 0.0625, %v650_v13  ;;  %vm679_vm0 = vweird.f32 %v662_v54 }
 0x4b6   :  { %v657_v57 = vsub.f32 %v653_v56, %v655_v55 }
 0x4b8   :  { %v661_v58 = vadd.f32 1e-05, %v657_v57 }
 0x4ba   :  { %v776_v59 = vpop.eup %775  ;;  %777 = vrsqrt.f32 %v661_v58  ;;  %vm669_vm3 = vweird.f32 %v661_v58 }
 0x4bb   :  { %v674_v21 = vmul.f32 %v776_v59, %v662_v54  ;;  %vm680_vm15 = vweird.f32 %v776_v59 }
 0x4bc   :  { %vm681_vm1 = vmor %vm679_vm0, %vm680_vm15 }
 0x4bd   :  { %v675_v60 = vmul.f32 %v776_v59, %v674_v21 }
 0x4bf   :  { %v676_v61 = vmul.f32 0.5, %v675_v60 }
 0x4c0   :  { %v778_v62 = vpop.eup %777 }
 0x4c1   :  { %v677_v63 = vsub.f32 1.5, %v676_v61  ;;  %v664_v1 = vmul.f32 %v778_v62, %v661_v58  ;;  %vm670_vm2 = vweird.f32 %v778_v62 }
 0x4c2   :  { %vm671_vm4 = vmor %vm669_vm3, %vm670_vm2 }
 0x4c3   :  { %v678_v2 = vmul.f32 %v776_v59, %v677_v63  ;;  %v665_v3 = vmul.f32 %v778_v62, %v664_v1 }
 0x4c5   :  { %v682_v7 = vsel %vm681_vm1, %v776_v59, %v678_v2  ;;  %v666_v8 = vmul.f32 0.5, %v665_v3 }
 0x4c6   :  { %v684_v9 = vmul.f32 %v682_v7, %v660_v4 }
 0x4c7   :  { %v667_v11 = vsub.f32 1.5, %v666_v8 }
 0x4c8   :  { %v690_v12 = vmul.f32 %v765_v5, %v684_v9 }
 0x4c9   :  { %v668_v15 = vmul.f32 %v778_v62, %v667_v11 }
 0x4ca   :  { %v696_v17 = vadd.f32 %v766_v10, %v690_v12 }
 0x4cb   :  { %v672_v18 = vsel %vm671_vm4, %v778_v62, %v668_v15 }
 0x4cc   :  { %v683_v19 = vmul.f32 %v672_v18, %v659_v16  ;;  %698 = vst [vmem:[#allocation10 + $0x8] sm:$0xff] %v696_v17 }
 0x4ce   :  { %v689_v43 = vmul.f32 %v765_v5, %v683_v19 }
 0x4d0   :  { %v695_v20 = vadd.f32 %v766_v10, %v689_v43 }
 0x4d2   :  { %697 = vst [vmem:[#allocation10] sm:$0xff] %v695_v20 }
 0x4d3   :  { %711 = dma.vmem_to_hbm [thread:$0]  %s704_s13, 256, %s706_s17, [#allocation4], %s908_s26, %s908_s26, %s909_s27  }
 0x4d4   :  { %905 = dma.done.wait [#allocation4], 256  }
 0x4d5   :  { %906 = vsyncadd [#allocation4], 4294967040 }
 0x4d6   :  { %716 = vsyncpa [#allocation3], 1 }
 0x4d7   :  { %717 = vsyncpa [#allocation6], 1 }
 0x4d8   :  { %718 = vsyncpa [#allocation9], 1 }
 0x4d9   :  { %719 = vsyncpa [#allocation4], 1 }

</bundles_post_ra>
